<compile_context>
chip_gen: v6e
topology: v6e:2x2x1
jax: 0.10.0
libtpu: 0.0.40
codegen_flags: <defaults>
</compile_context>

<pallas_src>
import jax
import jax.numpy as jnp
from jax.experimental import pallas as pl
from jax.experimental.pallas import tpu as pltpu


_N_TARGET_TILES = 8  # keep >= 2 (ideally 4-8) tiles so v7x's 2 TCs both get work


def _mlp_kernel(x_ref, w1_ref, b1_ref, w2_ref, b2_ref, o_ref):
    # Batch-on-lanes layout:
    #   x_ref : (2, bm)    inputs (features on sublanes, batch on lanes)
    #   w1_ref: (16, 2)    fc1 weight, PyTorch (out, in) layout, compute dtype
    #   b1_ref: (16, 1)    fc1 bias (lane-broadcast), compute dtype
    #   w2_ref: (16, 1)    fc2 weight (transposed), reduced over sublanes
    #   b2_ref: (1, 1)     fc2 bias, f32 SMEM scalar
    #   o_ref : (1, bm)    output, batch on lanes (lane-dense store), f32
    cdt = w1_ref.dtype
    x = x_ref[...].astype(cdt)  # no-op when x already arrives in compute dtype
    w1 = w1_ref[...]

    # fc1 (K=2): two outer-product broadcast FMAs on the VPU - no MXU.
    # TODO(synk): a stride-0 sublane-broadcast load (pl.ds(0, 16, stride=0))
    # could move the x-row broadcast onto the idle vld slots (few-% win).
    h = w1[:, 0:1] * x[0:1, :] + w1[:, 1:2] * x[1:2, :] + b1_ref[...]
    h = jnp.maximum(h, 0.0)  # ReLU

    # fc2 (N=1): weighted sublane reduction, accumulated in f32, + SMEM bias.
    y = jnp.sum(w2_ref[...] * h, axis=0, keepdims=True, dtype=jnp.float32)
    o_ref[...] = (y + b2_ref[0, 0]).astype(o_ref.dtype)


def _supports_bf16_vpu():
    # bf16 VALU exists on v6e and newer TensorCores; v5e/v5p and older do not.
    try:
        kind = jax.devices()[0].device_kind.lower()
    except Exception:
        return False
    return any(tag in kind for tag in ("v6", "v7", "tpu7"))


def _round_up(n, m):
    return (n + m - 1) // m * m


def _pick_bm(batch, compute_dtype, bm=None):
    # bf16 halves the (16, bm) intermediate footprint, so it can afford a
    # larger tile while staying under the default scoped-VMEM limit.
    bm_max = 65536 if compute_dtype == jnp.bfloat16 else 16384
    if bm is None:
        bm = _round_up(pl.cdiv(int(batch), _N_TARGET_TILES), 128)
    else:
        bm = _round_up(int(bm), 128)  # force lane-dense (multiple-of-128) tiles
    return int(max(128, min(bm_max, bm)))


def classifier_forward_t(x_t, w1, b1, w2, b2, *, bm=None, compute_dtype=None):
    """Preferred zero-copy entry point: feature-major input.

    x_t: (2, B) float32/bfloat16 (features leading, batch on the lane axis)
    Returns (1, B) float32.
    """
    assert x_t.shape[0] == 2
    B = x_t.shape[1]
    if compute_dtype is None:
        compute_dtype = jnp.bfloat16 if _supports_bf16_vpu() else jnp.float32
    bm = _pick_bm(B, compute_dtype, bm)
    n_tiles = pl.cdiv(B, bm)  # ragged last tile is masked by Pallas

    w1_c = w1.astype(compute_dtype)                    # (16, 2)
    b1_c = b1.reshape(16, 1).astype(compute_dtype)     # (16, 1)
    w2_c = w2.reshape(1, 16).T.astype(compute_dtype)   # (16, 1)
    b2_c = b2.reshape(1, 1).astype(jnp.float32)        # (1, 1) -> SMEM scalar

    return pl.pallas_call(
        _mlp_kernel,
        out_shape=jax.ShapeDtypeStruct((1, B), jnp.float32),
        grid=(n_tiles,),
        in_specs=[
            pl.BlockSpec((2, bm), lambda i: (0, i)),      # x tile (pipelined)
            pl.BlockSpec((16, 2), lambda i: (0, 0)),      # w1 (resident)
            pl.BlockSpec((16, 1), lambda i: (0, 0)),      # b1 (resident)
            pl.BlockSpec((16, 1), lambda i: (0, 0)),      # w2^T (resident)
            pl.BlockSpec(memory_space=pltpu.MemorySpace.SMEM),  # b2 scalar
        ],
        out_specs=pl.BlockSpec((1, bm), lambda i: (0, i)),
        compiler_params=pltpu.CompilerParams(
            dimension_semantics=("parallel",),  # v7x: split batch over 2 TCs
        ),
    )(x_t, w1_c, b1_c, w2_c, b2_c)


def classifier_forward(x, w1, b1, w2, b2, *, bm=None, compute_dtype=None):
    """PyTorch-layout forward: fc2(relu(fc1(x))).

    x : (B, 2) float32
    w1: (16, 2), b1: (16,)   -- PyTorch Linear(2, 16) (out, in) layout
    w2: (1, 16), b2: (1,)    -- PyTorch Linear(16, 1)
    returns (B, 1) float32
    """
    if compute_dtype is None:
        compute_dtype = jnp.bfloat16 if _supports_bf16_vpu() else jnp.float32
    # Single fused XLA pass: transpose to feature-major + cast to the compute
    # dtype (halves x's HBM bytes when bf16).  To avoid even this pass, have
    # the producer emit (2, B) directly and call classifier_forward_t.
    x_t = x.T.astype(compute_dtype)  # (2, B)
    y_t = classifier_forward_t(x_t, w1, b1, w2, b2, bm=bm,
                               compute_dtype=compute_dtype)
    return y_t.T  # (B, 1)


def init_params(key):
    k1, k2, k3, k4 = jax.random.split(key, 4)
    # Deterministic synthetic init in PyTorch (out, in) layouts.
    w1 = jax.random.uniform(k1, (16, 2), jnp.float32, -0.7, 0.7)
    b1 = jax.random.uniform(k2, (16,), jnp.float32, -0.1, 0.1)
    w2 = jax.random.uniform(k3, (1, 16), jnp.float32, -0.25, 0.25)
    b2 = jax.random.uniform(k4, (1,), jnp.float32, -0.1, 0.1)
    return w1, b1, w2, b2


if __name__ == "__main__":
    key = jax.random.PRNGKey(0)
    kx, kp = jax.random.split(key)

    w1, b1, w2, b2 = init_params(kp)

    compute_dtype = jnp.bfloat16 if _supports_bf16_vpu() else jnp.float32
    # bf16 elementwise chain (v6e/v7x) loses ~3 decimal digits vs the f32 ref.
    tol = 3e-2 if compute_dtype == jnp.bfloat16 else 1e-5

    # B=8: single tile; B=300: multi-tile + ragged (masked) last tile.
    for B in (8, 300):
        kx, sub = jax.random.split(kx)
        x = jax.random.normal(sub, (B, 2), dtype=jnp.float32)

        out = classifier_forward(x, w1, b1, w2, b2)
        out = jax.block_until_ready(out)

        # Reference in plain JAX (PyTorch semantics: x @ W.T + b).
        ref = jnp.maximum(x @ w1.T + b1, 0.0) @ w2.T + b2
        assert out.shape == (B, 1)
        assert jnp.allclose(out, ref, atol=tol, rtol=tol), (
            f"mismatch at B={B}: max abs err {jnp.max(jnp.abs(out - ref)):.3e}")

    print("KERNEL_OK")
</pallas_src>

<mosaic_0001>
module attributes {stable_mosaic.version = 11 : i64} {
  func.func @_mlp_kernel(%arg0: i32, %arg1: memref<2x128xf32, #tpu.memory_space<vmem>>, %arg2: memref<16x2xf32, #tpu.memory_space<vmem>>, %arg3: memref<16x1xf32, #tpu.memory_space<vmem>>, %arg4: memref<16x1xf32, #tpu.memory_space<vmem>>, %arg5: memref<1x1xf32, #tpu.memory_space<smem>>, %arg6: memref<1x128xf32, #tpu.memory_space<vmem>>) attributes {dimension_semantics = [#tpu.dimension_semantics<parallel>], iteration_bounds = array<i64: 1>, scalar_prefetch = 0 : i64, scratch_operands = 0 : i64, tpu.core_type = #tpu.core_type<tc>, window_params = [{transform_indices = @transform_0, window_bounds = array<i64: 2, 128>}, {pipeline_mode = #tpu.pipeline_mode<synchronous>, transform_indices = @transform_1, window_bounds = array<i64: 16, 2>}, {pipeline_mode = #tpu.pipeline_mode<synchronous>, transform_indices = @transform_2, window_bounds = array<i64: 16, 1>}, {pipeline_mode = #tpu.pipeline_mode<synchronous>, transform_indices = @transform_3, window_bounds = array<i64: 16, 1>}, {transform_indices = @transform_4, window_bounds = array<i64: 1, 1>}, {transform_indices = @transform_5, window_bounds = array<i64: 1, 128>}]} {
    %c0 = arith.constant 0 : index
    %c0_0 = arith.constant 0 : index
    %0 = vector.load %arg1[%c0, %c0_0] : memref<2x128xf32, #tpu.memory_space<vmem>>, vector<2x128xf32>
    %c0_1 = arith.constant 0 : index
    %c0_2 = arith.constant 0 : index
    %1 = vector.load %arg2[%c0_1, %c0_2] : memref<16x2xf32, #tpu.memory_space<vmem>>, vector<16x2xf32>
    %2 = vector.extract_strided_slice %1 {offsets = [0, 0], sizes = [16, 1], strides = [1, 1]} : vector<16x2xf32> to vector<16x1xf32>
    %3 = vector.extract_strided_slice %0 {offsets = [0, 0], sizes = [1, 128], strides = [1, 1]} : vector<2x128xf32> to vector<1x128xf32>
    %4 = vector.broadcast %2 : vector<16x1xf32> to vector<16x128xf32>
    %5 = vector.broadcast %3 : vector<1x128xf32> to vector<16x128xf32>
    %6 = arith.mulf %4, %5 : vector<16x128xf32>
    %7 = vector.extract_strided_slice %1 {offsets = [0, 1], sizes = [16, 1], strides = [1, 1]} : vector<16x2xf32> to vector<16x1xf32>
    %8 = vector.extract_strided_slice %0 {offsets = [1, 0], sizes = [1, 128], strides = [1, 1]} : vector<2x128xf32> to vector<1x128xf32>
    %9 = vector.broadcast %7 : vector<16x1xf32> to vector<16x128xf32>
    %10 = vector.broadcast %8 : vector<1x128xf32> to vector<16x128xf32>
    %11 = arith.mulf %9, %10 : vector<16x128xf32>
    %12 = arith.addf %6, %11 : vector<16x128xf32>
    %c0_3 = arith.constant 0 : index
    %c0_4 = arith.constant 0 : index
    %13 = vector.load %arg3[%c0_3, %c0_4] : memref<16x1xf32, #tpu.memory_space<vmem>>, vector<16x1xf32>
    %14 = vector.broadcast %13 : vector<16x1xf32> to vector<16x128xf32>
    %15 = arith.addf %12, %14 : vector<16x128xf32>
    %cst = arith.constant 0.000000e+00 : f32
    %16 = vector.broadcast %cst : f32 to vector<16x128xf32>
    %17 = arith.maximumf %15, %16 : vector<16x128xf32>
    %c0_5 = arith.constant 0 : index
    %c0_6 = arith.constant 0 : index
    %18 = vector.load %arg4[%c0_5, %c0_6] : memref<16x1xf32, #tpu.memory_space<vmem>>, vector<16x1xf32>
    %19 = vector.broadcast %18 : vector<16x1xf32> to vector<16x128xf32>
    %20 = arith.mulf %19, %17 : vector<16x128xf32>
    %cst_7 = arith.constant dense<0.000000e+00> : vector<128xf32>
    %21 = vector.multi_reduction <add>, %20, %cst_7 [0] : vector<16x128xf32> to vector<128xf32>
    %22 = vector.shape_cast %21 : vector<128xf32> to vector<1x128xf32>
    %c0_8 = arith.constant 0 : index
    %c0_9 = arith.constant 0 : index
    %23 = memref.load %arg5[%c0_8, %c0_9] : memref<1x1xf32, #tpu.memory_space<smem>>
    %24 = vector.broadcast %23 : f32 to vector<1x128xf32>
    %25 = arith.addf %22, %24 : vector<1x128xf32>
    %c0_10 = arith.constant 0 : index
    %c0_11 = arith.constant 0 : index
    %26 = vector.load %arg6[%c0_10, %c0_11] : memref<1x128xf32, #tpu.memory_space<vmem>>, vector<1x128xf32>
    tpu.vector_store %arg6[%c0_10, %c0_11], %25 {strides = array<i32>} : memref<1x128xf32, #tpu.memory_space<vmem>>, vector<1x128xf32>,
    return
  }
  func.func @transform_0(%arg0: i32) -> (i32, i32) {
    %c0_i32 = arith.constant 0 : i32
    %c0_i32_0 = arith.constant 0 : i32
    return %c0_i32, %arg0 : i32, i32
  }
  func.func @transform_1(%arg0: i32) -> (i32, i32) {
    %c0_i32 = arith.constant 0 : i32
    %c0_i32_0 = arith.constant 0 : i32
    %c0_i32_1 = arith.constant 0 : i32
    return %c0_i32, %c0_i32_0 : i32, i32
  }
  func.func @transform_2(%arg0: i32) -> (i32, i32) {
    %c0_i32 = arith.constant 0 : i32
    %c0_i32_0 = arith.constant 0 : i32
    %c0_i32_1 = arith.constant 0 : i32
    return %c0_i32, %c0_i32_0 : i32, i32
  }
  func.func @transform_3(%arg0: i32) -> (i32, i32) {
    %c0_i32 = arith.constant 0 : i32
    %c0_i32_0 = arith.constant 0 : i32
    %c0_i32_1 = arith.constant 0 : i32
    return %c0_i32, %c0_i32_0 : i32, i32
  }
  func.func @transform_4(%arg0: i32) -> (i32, i32) {
    %c0_i32 = arith.constant 0 : i32
    %c0_i32_0 = arith.constant 0 : i32
    %c0_i32_1 = arith.constant 0 : i32
    return %c0_i32, %c0_i32_0 : i32, i32
  }
  func.func @transform_5(%arg0: i32) -> (i32, i32) {
    %c0_i32 = arith.constant 0 : i32
    %c0_i32_0 = arith.constant 0 : i32
    return %c0_i32, %arg0 : i32, i32
  }
}

</mosaic_0001>

<bundles_post_ra>
// kernel: tpu_custom_call.1
= control target key start
LH: loop header
LB: loop body
LE: loop exit
PB: predicated region body
PF: predicated region fallthrough
CT: control target
= control target key end

     0   :  { %v140_v1 = vmov 1   ;;  %v141_v2 = vmov 0   ;;  %s200_s0 = inlined_call_operand.vmem [shape: f32[2,8], index: 0, kind: input, shape index: {}]   ;;  %s201_s1 = inlined_call_operand.vmem [shape: f32[16,2], index: 1, kind: input, shape index: {}]   ;;  %s202_s2 = inlined_call_operand.vmem [shape: f32[16,1], index: 2, kind: input, shape index: {}]   ;;  %s203_s3 = inlined_call_operand.vmem [shape: f32[16,1], index: 3, kind: input, shape index: {}]   ;;  %s204_s4 = inlined_call_operand.<no memory space> [shape: f32[1,1], index: 4, kind: input, shape index: {}]   ;;  %s205_s5 = inlined_call_operand.hbm [shape: f32[1,8], index: 5, kind: output, shape index: {}]  }
   0x1   :  { %v23_v0 = vld [vmem:[%s201_s1] sm:$0xff]  ;;  %116 = vset.pattern.permute.xlu1 %v140_v1  ;;  %115 = vset.pattern.permute.xlu0 %v141_v2 }
   0x2   :  { %42 = vperm.xlu1 %116, %v23_v0   ;;  %27 = vperm.xlu0 %115, %v23_v0  }
   0x3   :  { %11 = vsyncpa [#allocation4], 0  ;;  %v24_v3 = vld [vmem:[%s201_s1 + $0x8] sm:$0xff]  ;;  %v57_v4 = vld [vmem:[%s202_s2] sm:$0xff]  ;;  %v35_v8 = vlaneseq  ;;  %v95_v41 = vstv %s204_s4 }
   0x4   :  { %v58_v5 = vld [vmem:[%s202_s2 + $0x8] sm:$0xff]  ;;  %v73_v6 = vld [vmem:[%s203_s3] sm:$0xff] }
   0x5   :  { %v74_v7 = vld [vmem:[%s203_s3 + $0x8] sm:$0xff]  ;;  %v36_v9 = vshrl.u32 %v35_v8, 7  ;;  %v22_v12 = vld [vmem:[%s200_s0] sm:$0x3]  ;;  %s142_s3 = smov [#allocation3]  }
   0x6   :  { %46 = vperm.xlu1 %116, %v24_v3   ;;  %32 = vperm.xlu0 %115, %v24_v3   ;;  %s104_s6 = sshll.u32 %s142_s3, 4  ;;  %s105_s6 = int_to_ptr.vmem [resolvable:$true] %s104_s6 }
   0x7   :  { %v51_v10 = vsub.s32 1, %v36_v9  ;;  %v37_v11 = vsub.s32 0, %v36_v9  ;;  %s118_s7 = scalar_lea.vmem %s105_s6, 16  ;;  %s122_s8 = scalar_lea.vmem %s105_s6, 32 }
   0x8   :  { %p119_p0 = scmp.ne.s32.totalorder %s105_s6, %s118_s7  ;;  %p123_p1 = scmp.lt.s32.totalorder %s105_s6, %s105_s6 }
   0x9   :  { %v52_v13 = vrot.slane %v22_v12, %v51_v10  ;;  %v38_v14 = vrot.slane %v22_v12, %v37_v11  ;;  %p124_p2 = scmp.lt.s32.totalorder %s122_s8, %s118_s7 }
   0xa   :  { %117 = vset.pattern.permute.xlu1 %v141_v2  ;;  %61 = vperm.xlu0 %115, %v57_v4  }
   0xb   :  { %66 = vperm.xlu1 %117, %v58_v5   ;;  %p125_p3 = por %p124_p2, %p123_p1 }
   0xd   :  { %p126_p4 = pnand %p125_p3, %p119_p0 }
   0xe   :  { %77 = vperm.xlu0 %115, %v73_v6  }
   0xf   :  { %82 = vperm.xlu1 %117, %v74_v7  }
  0x7d   :  { %v43_v15 = vpop.permute.xlu1 %42  ;;  %v28_v16 = vpop.permute.xlu0 %27 }
  0x7e   :  { %v53_v17 = vmul.f32 %v52_v13, %v43_v15  ;;  %v39_v18 = vmul.f32 %v38_v14, %v28_v16 }
  0x80   :  { %v55_v23 = vadd.f32 %v53_v17, %v39_v18 }
  0x81   :  { %v47_v19 = vpop.permute.xlu1 %46  ;;  %v33_v20 = vpop.permute.xlu0 %32 }
  0x82   :  { %v54_v21 = vmul.f32 %v52_v13, %v47_v19  ;;  %v40_v22 = vmul.f32 %v38_v14, %v33_v20 }
  0x84   :  { %v56_v24 = vadd.f32 %v54_v21, %v40_v22 }
  0x85   :  { %v62_v25 = vpop.permute.xlu0 %61 }
  0x86   :  { %v69_v26 = vadd.f32 %v62_v25, %v55_v23  ;;  %v67_v27 = vpop.permute.xlu1 %66 }
  0x87   :  { %v70_v28 = vadd.f32 %v67_v27, %v56_v24 }
  0x88   :  { %v71_v29 = vmax.f32 %v69_v26, 0.0 }
  0x89   :  { %v72_v30 = vmax.f32 %v70_v28, 0.0  ;;  %v78_v31 = vpop.permute.xlu0 %77 }
  0x8a   :  { %v85_v32 = vmul.f32 %v78_v31, %v71_v29  ;;  %v83_v33 = vpop.permute.xlu1 %82 }
  0x8b   :  { %v86_v34 = vmul.f32 %v83_v33, %v72_v30 }
  0x8d   :  { %v87_v35 = vadd.f32 %v86_v34, %v85_v32 }
  0x8f   :  { %v88_v36 = vrot.slane %v87_v35, 4 }
  0x91   :  { %v89_v37 = vadd.f32 %v88_v36, %v87_v35 }
  0x93   :  { %v90_v38 = vrot.slane %v89_v37, 2 }
  0x95   :  { %v91_v39 = vadd.f32 %v90_v38, %v89_v37 }
  0x97   :  { %v92_v40 = vrot.slane %v91_v39, 1 }
  0x99   :  { %v93_v42 = vadd.f32 %v92_v40, %v91_v39 }
  0x9b   :  { %v96_v43 = vadd.f32 %v95_v41, %v93_v42 }
  0x9d   :  { %97 = vst [vmem:[#allocation3] sm:$0x1] %v96_v43 }
  0x9e   :  { %129 = shalt.err (!%p126_p4)
}
  0x9f   :  { %107 = dma.vmem_to_hbm [thread:$0]  %s105_s6, 16, %s205_s5, [#allocation4]  }
  0xa0   :  { %138 = dma.done.wait [#allocation4], 16  }
  0xa1   :  { %139 = vsyncadd [#allocation4], 4294967280 }
  0xa2   :  { %111 = vsyncpa [#allocation4], 1 }

</bundles_post_ra>
